<compile_context>
chip_gen: v5e
topology: v5e:2x2
jax: 0.10.0
libtpu: 0.0.40
codegen_flags: <defaults>
</compile_context>

<pallas_src>
import jax
import jax.numpy as jnp
from jax.experimental import pallas as pl
from jax.experimental.pallas import tpu as pltpu

_LANE = 128                               # vreg lane width
_SUBLANE = 8                              # f32 sublane count
_TARGET_BLOCK_BYTES = 8 * 1024 * 1024     # per-block budget (amortizes grid-step cost)
_VMEM_LIMIT_BYTES = 48 * 1024 * 1024      # 8 MiB blk x (in+out) x 2 bufs = 32 MiB + headroom


def _dm_kernel(x_ref, o_ref):
    # Pure VPU elementwise: x / 0.5 - 1  ==  x * 2 - 1 (exact for floats).
    o_ref[...] = (x_ref[...] * 2.0 - 1.0).astype(o_ref.dtype)


def _choose_layout(total):
    """Lane-dense (rows, cols) layout for `total` elements, or None if ragged.

    Prefers wide columns (fewer, fatter rows -> fewer grid steps / full-width
    unmasked stores) and a row count divisible by 8 (full sublanes).
    """
    for c in (1024, 512, 256, _LANE):
        if total % c == 0 and (total // c) % _SUBLANE == 0:
            return total // c, c
    for c in (1024, 512, 256, _LANE):
        if total % c == 0:
            return total // c, c
    return None


def dm_forward(x, *, donate=False):
    """Apply Dm.forward (x / 0.5 - 1) via a Pallas TPU kernel.

    donate=True aliases the input buffer into the output (only do this when the
    caller's `x` is dead after the call; otherwise XLA inserts a defensive copy).
    """
    if x.size == 0:
        return x

    if not jnp.issubdtype(x.dtype, jnp.floating):
        # PyTorch promotes int / 0.5 to float; no value in a standalone kernel here.
        return x / 0.5 - 1.0

    layout = _choose_layout(x.size)
    if layout is None:
        # Ragged total (not a multiple of 128): wrapper-side pad + slice would add
        # two full HBM passes to a purely bandwidth-bound op, so let XLA fuse it.
        # TODO(synk): in-kernel masked-tail variant if a standalone kernel is ever required.
        return x * 2.0 - 1.0

    R, C = layout
    itemsize = jnp.dtype(x.dtype).itemsize

    # Contiguous row-major reshape: metadata only, no data movement.
    x2d = x.reshape(R, C)

    # Rows per block: multiple of 8 fitting the ~8 MiB budget, clamped to R
    # (block == full sublane extent is always legal).
    budget_rows = max(_SUBLANE,
                      (_TARGET_BLOCK_BYTES // (C * itemsize)) // _SUBLANE * _SUBLANE)
    rows_per_block = min(R, budget_rows)
    n_blocks = pl.cdiv(R, rows_per_block)   # partial last block handled by Pallas masking

    call_kwargs = {}
    if donate:
        call_kwargs["input_output_aliases"] = {0: 0}

    out2d = pl.pallas_call(
        _dm_kernel,
        out_shape=jax.ShapeDtypeStruct((R, C), x.dtype),
        grid_spec=pl.GridSpec(
            grid=(n_blocks,),
            in_specs=[pl.BlockSpec((rows_per_block, C), lambda i: (i, 0))],
            out_specs=pl.BlockSpec((rows_per_block, C), lambda i: (i, 0)),
        ),
        compiler_params=pltpu.CompilerParams(
            dimension_semantics=("parallel",),   # v7x megacore split; no-op on v5e/v6e
            vmem_limit_bytes=_VMEM_LIMIT_BYTES,
        ),
        **call_kwargs,
    )(x2d)

    return out2d.reshape(x.shape)


if __name__ == "__main__":
    key = jax.random.PRNGKey(0)

    # Primary check: small NCHW input consistent with the image-normalization module.
    x = jax.random.uniform(key, (2, 4, 16, 16), dtype=jnp.float32)
    y = dm_forward(x)
    jax.block_until_ready(y)
    y_ref = x / 0.5 - 1.0
    assert y.shape == x.shape and y.dtype == x.dtype
    assert jnp.allclose(y, y_ref, atol=1e-6), "mismatch vs reference (small path)"

    # Donated-input variant (aliased output buffer).
    x_d = jax.random.uniform(jax.random.PRNGKey(2), (2, 4, 16, 16), dtype=jnp.float32)
    y_d = dm_forward(x_d, donate=True)
    jax.block_until_ready(y_d)
    assert jnp.allclose(y_d, x_d / 0.5 - 1.0, atol=1e-6), "mismatch vs reference (donated path)"

    # Larger input to exercise the multi-block, parallel-grid path (16 MiB -> 2 blocks).
    x_big = jax.random.uniform(jax.random.PRNGKey(1), (16, 8, 128, 256), dtype=jnp.float32)
    y_big = dm_forward(x_big)
    jax.block_until_ready(y_big)
    assert jnp.allclose(y_big, x_big / 0.5 - 1.0, atol=1e-6), "mismatch vs reference (tiled path)"

    # Ragged total (not divisible by 128): fused plain-JAX fallback, no pad/slice passes.
    x_rag = jax.random.uniform(jax.random.PRNGKey(3), (3, 5, 7), dtype=jnp.float32)
    y_rag = dm_forward(x_rag)
    jax.block_until_ready(y_rag)
    assert jnp.allclose(y_rag, x_rag / 0.5 - 1.0, atol=1e-6), "mismatch vs reference (ragged path)"

    print("KERNEL_OK")
</pallas_src>

<mosaic_0001>
module attributes {stable_mosaic.version = 11 : i64} {
  func.func @_dm_kernel(%arg0: i32, %arg1: memref<8x256xf32, #tpu.memory_space<vmem>>, %arg2: memref<8x256xf32, #tpu.memory_space<vmem>>) attributes {dimension_semantics = [#tpu.dimension_semantics<parallel>], iteration_bounds = array<i64: 1>, scalar_prefetch = 0 : i64, scratch_operands = 0 : i64, tpu.core_type = #tpu.core_type<tc>, window_params = [{transform_indices = @transform_0, window_bounds = array<i64: 8, 256>}, {transform_indices = @transform_1, window_bounds = array<i64: 8, 256>}]} {
    %c0 = arith.constant 0 : index
    %c0_0 = arith.constant 0 : index
    %0 = vector.load %arg1[%c0, %c0_0] : memref<8x256xf32, #tpu.memory_space<vmem>>, vector<8x256xf32>
    %cst = arith.constant 2.000000e+00 : f32
    %1 = vector.broadcast %cst : f32 to vector<8x256xf32>
    %2 = arith.mulf %0, %1 : vector<8x256xf32>
    %cst_1 = arith.constant 1.000000e+00 : f32
    %3 = vector.broadcast %cst_1 : f32 to vector<8x256xf32>
    %4 = arith.subf %2, %3 : vector<8x256xf32>
    %c0_2 = arith.constant 0 : index
    %c0_3 = arith.constant 0 : index
    %5 = vector.load %arg2[%c0_2, %c0_3] : memref<8x256xf32, #tpu.memory_space<vmem>>, vector<8x256xf32>
    tpu.vector_store %arg2[%c0_2, %c0_3], %4 {strides = array<i32>} : memref<8x256xf32, #tpu.memory_space<vmem>>, vector<8x256xf32>,
    return
  }
  func.func @transform_0(%arg0: i32) -> (i32, i32) {
    %c0_i32 = arith.constant 0 : i32
    %c0_i32_0 = arith.constant 0 : i32
    return %arg0, %c0_i32 : i32, i32
  }
  func.func @transform_1(%arg0: i32) -> (i32, i32) {
    %c0_i32 = arith.constant 0 : i32
    %c0_i32_0 = arith.constant 0 : i32
    return %arg0, %c0_i32 : i32, i32
  }
}

</mosaic_0001>

<bundles_post_ra>
// kernel: tpu_custom_call.1
= control target key start
LH: loop header
LB: loop body
LE: loop exit
PB: predicated region body
PF: predicated region fallthrough
CT: control target
= control target key end

     0   :  { %6 = vsyncpa [#allocation3], 0  ;;  %s122_s0 = inlined_call_operand.hbm [shape: f32[8,256], index: 0, kind: input, shape index: {}]   ;;  %s123_s1 = inlined_call_operand.hbm [shape: f32[8,256], index: 1, kind: output, shape index: {}]  }
   0x1   :  { %7 = vsyncpa [#allocation4], 0  ;;  %s13_s8 = sshll.u32 %s122_s0, 4  ;;  %s104_s9 = smov [#allocation2]   ;;  %s14_s8 = int_to_ptr.hbm [resolvable:$true] %s13_s8 }
   0x2   :  { %s15_s10 = sshll.u32 %s104_s9, 4  ;;  %s16_s10 = int_to_ptr.vmem [resolvable:$true] %s15_s10 }
   0x3   :  { %18 = dma.hbm_to_vmem [thread:$0]  %s14_s8, 256, %s16_s10, [#allocation3]  }
   0x4   :  { %100 = dma.done.wait [#allocation3], 256  }
   0x5   :  { %101 = vsyncadd [#allocation3], 4294967040  ;;  %v23_v0 = vld [vmem:[#allocation2] sm:$0xff]  ;;  %v24_v1 = vld [vmem:[#allocation2 + $0x8] sm:$0xff]  ;;  %s105_s11 = smov [#allocation5]   ;;  %s38_s15 = sshll.u32 %s123_s1, 4  ;;  %s39_s15 = int_to_ptr.hbm [resolvable:$true] %s38_s15 }
   0x6   :  { %v25_v2 = vmul.f32 2.0, %v23_v0  ;;  %v26_v3 = vmul.f32 2.0, %v24_v1  ;;  %s36_s12 = sshll.u32 %s105_s11, 4  ;;  %s37_s12 = int_to_ptr.vmem [resolvable:$true] %s36_s12 }
   0x8   :  { %v48_v4 = vadd.f32 -1.0, %v25_v2  ;;  %v49_v5 = vadd.f32 -1.0, %v26_v3 }
   0xa   :  { %29 = vst [vmem:[#allocation5] sm:$0xff] %v48_v4 }
   0xb   :  { %30 = vst [vmem:[#allocation5 + $0x8] sm:$0xff] %v49_v5 }
   0xc   :  { %41 = dma.vmem_to_hbm [thread:$0]  %s37_s12, 256, %s39_s15, [#allocation4]  }
   0xd   :  { %102 = dma.done.wait [#allocation4], 256  }
   0xe   :  { %103 = vsyncadd [#allocation4], 4294967040 }
   0xf   :  { %46 = vsyncpa [#allocation3], 1 }
  0x10   :  { %47 = vsyncpa [#allocation4], 1 }

</bundles_post_ra>
